<compile_context>
chip_gen: v7x
topology: tpu7x:2x2x1
jax: 0.10.0
libtpu: 0.0.40
codegen_flags: <defaults>
</compile_context>

<pallas_src>
import jax
import jax.numpy as jnp
import numpy as np
from jax.experimental import pallas as pl
from jax.experimental.pallas import tpu as pltpu

C_OUT = 4
_BLOCK_ELEMS = 512 * 1024            # elements per grid step (~4 MiB/step for f32 in+out)
_LANE_CHOICES = (4096, 2048, 1024, 512, 256, 128)


def _presence_kernel(x_ref, o_ref):
    """x_ref: (R, L) lane-dense block of the 2x-expanded time features.

    Lane k of a row holds time[b, k//2] (flattened row-major); even lanes take
    sin(pi*x), odd lanes take cos(pi*x), which reproduces the torch.cat order
    [sin(dow), cos(dow), sin(hour), cos(hour)] per sample.
    """
    x = x_ref[...].astype(jnp.float32)
    arg = jnp.float32(np.pi) * x
    lane = jax.lax.broadcasted_iota(jnp.int32, x.shape, 1)
    even = (lane % 2) == 0
    # NOTE: if EUP ever saturates, sin(arg + pi/2 on odd lanes) halves the
    # transcendental count; kept as sin/cos to match the reference bit-for-bit.
    o_ref[...] = jnp.where(even, jnp.sin(arg), jnp.cos(arg)).astype(o_ref.dtype)


@jax.jit
def presence_aware(time):
    """time: (B, C>=2) -> (B, 4) float32, matching PresenceAware.forward."""
    b = time.shape[0]
    t2 = time if time.shape[1] == 2 else time[:, :2]

    # Flat row-major output order per sample is sin/cos of [dow, dow, hour, hour].
    rep = jnp.repeat(t2, 2, axis=1).reshape(-1)          # (4*B,), original dtype
    total = rep.shape[0]

    lanes = next((l for l in _LANE_CHOICES if total % l == 0), None)
    padded = lanes is None
    if padded:                                           # ragged B: small pad + slice
        lanes = 2048 if total >= 2048 else 128
        full = pl.cdiv(total, lanes) * lanes
        rep = jnp.pad(rep, (0, full - total))
        total_padded = full
    else:
        total_padded = total
    x2d = rep.reshape(total_padded // lanes, lanes)      # metadata-only reshape
    rows = x2d.shape[0]

    block_rows = _BLOCK_ELEMS // lanes                   # multiple of 8 for every lane choice
    if rows >= 16:                                       # keep >= 2 grid steps (v7x megacore)
        block_rows = min(block_rows, ((rows + 15) // 16) * 8)
    block_rows = min(rows, block_rows)
    grid = (pl.cdiv(rows, block_rows),)

    in_bytes = x2d.size * x2d.dtype.itemsize
    out_bytes = rows * lanes * 4
    out2d = pl.pallas_call(
        _presence_kernel,
        out_shape=jax.ShapeDtypeStruct((rows, lanes), jnp.float32),
        grid_spec=pltpu.PrefetchScalarGridSpec(
            num_scalar_prefetch=0,
            grid=grid,
            in_specs=[pl.BlockSpec((block_rows, lanes), lambda i: (i, 0))],
            out_specs=pl.BlockSpec((block_rows, lanes), lambda i: (i, 0)),
        ),
        compiler_params=pltpu.CompilerParams(
            dimension_semantics=("parallel",)),
        cost_estimate=pl.CostEstimate(
            flops=3 * x2d.size,
            transcendentals=2 * x2d.size,
            bytes_accessed=in_bytes + out_bytes),
    )(x2d)

    out_flat = out2d.reshape(-1)
    if padded:
        out_flat = out_flat[:total]
    return out_flat.reshape(b, C_OUT)


def reference_forward(time):
    """Pure-JAX reference mirroring the PyTorch forward."""
    dow = time[:, 0:1].astype(jnp.float32)
    hour = time[:, 1:2].astype(jnp.float32)
    pi = jnp.float32(np.pi)
    return jnp.concatenate(
        [jnp.sin(pi * dow), jnp.cos(pi * dow),
         jnp.sin(pi * hour), jnp.cos(pi * hour)], axis=1)


if __name__ == "__main__":
    key = jax.random.PRNGKey(0)
    # Small shapes: (128, 2) exercises the aligned (reshape-only) path,
    # (18, 3) exercises the ragged pad/slice path and the C>2 column select.
    for (b, c) in ((128, 2), (18, 3)):
        key, sub = jax.random.split(key)
        time = jax.random.uniform(sub, (b, c), jnp.float32, 0.0, 2.0)
        out = jax.block_until_ready(presence_aware(time))
        ref = reference_forward(time)
        assert out.shape == (b, C_OUT), out.shape
        np.testing.assert_allclose(np.asarray(out), np.asarray(ref),
                                   rtol=1e-5, atol=1e-5)
    print("KERNEL_OK")
</pallas_src>

<mosaic_0001>
module attributes {stable_mosaic.version = 11 : i64} {
  func.func @_presence_kernel(%arg0: i32, %arg1: memref<1x512xf32, #tpu.memory_space<vmem>>, %arg2: memref<1x512xf32, #tpu.memory_space<vmem>>) attributes {dimension_semantics = [#tpu.dimension_semantics<parallel>], iteration_bounds = array<i64: 1>, scalar_prefetch = 0 : i64, scratch_operands = 0 : i64, tpu.core_type = #tpu.core_type<tc>, window_params = [{transform_indices = @transform_0, window_bounds = array<i64: 1, 512>}, {transform_indices = @transform_1, window_bounds = array<i64: 1, 512>}]} {
    %c0 = arith.constant 0 : index
    %c0_0 = arith.constant 0 : index
    %0 = vector.load %arg1[%c0, %c0_0] : memref<1x512xf32, #tpu.memory_space<vmem>>, vector<1x512xf32>
    %cst = arith.constant 3.14159274 : f32
    %1 = vector.broadcast %cst : f32 to vector<1x512xf32>
    %2 = arith.mulf %1, %0 : vector<1x512xf32>
    %3 = tpu.iota {dimensions = array<i32: 1>} : vector<1x512xi32>
    %c2_i32 = arith.constant 2 : i32
    %c0_i32 = arith.constant 0 : i32
    %4 = arith.cmpi eq, %c2_i32, %c0_i32 : i32
    %c1_i32 = arith.constant 1 : i32
    %5 = arith.select %4, %c1_i32, %c2_i32 : i32
    %6 = vector.broadcast %5 : i32 to vector<1x512xi32>
    %7 = arith.remsi %3, %6 : vector<1x512xi32>
    %c0_i32_1 = arith.constant 0 : i32
    %8 = vector.broadcast %c0_i32_1 : i32 to vector<1x512xi32>
    %9 = arith.cmpi ne, %7, %8 : vector<1x512xi32>
    %c0_i32_2 = arith.constant 0 : i32
    %10 = vector.broadcast %c0_i32_2 : i32 to vector<1x512xi32>
    %11 = arith.cmpi slt, %7, %10 : vector<1x512xi32>
    %c0_i32_3 = arith.constant 0 : i32
    %12 = arith.cmpi slt, %5, %c0_i32_3 : i32
    %13 = vector.broadcast %12 : i1 to vector<1x512xi1>
    %14 = vector.broadcast %13 : vector<1x512xi1> to vector<1x512xi1>
    %15 = arith.xori %11, %14 : vector<1x512xi1>
    %16 = arith.andi %15, %9 : vector<1x512xi1>
    %17 = vector.broadcast %5 : i32 to vector<1x512xi32>
    %18 = arith.addi %7, %17 : vector<1x512xi32>
    %19 = arith.select %16, %18, %7 : vector<1x512xi1>, vector<1x512xi32>
    %c0_i32_4 = arith.constant 0 : i32
    %20 = vector.broadcast %c0_i32_4 : i32 to vector<1x512xi32>
    %21 = arith.cmpi eq, %19, %20 : vector<1x512xi32>
    %22 = math.sin %2 : vector<1x512xf32>
    %23 = math.cos %2 : vector<1x512xf32>
    %24 = arith.select %21, %22, %23 : vector<1x512xi1>, vector<1x512xf32>
    %c0_5 = arith.constant 0 : index
    %c0_6 = arith.constant 0 : index
    %25 = vector.load %arg2[%c0_5, %c0_6] : memref<1x512xf32, #tpu.memory_space<vmem>>, vector<1x512xf32>
    tpu.vector_store %arg2[%c0_5, %c0_6], %24 {strides = array<i32>} : memref<1x512xf32, #tpu.memory_space<vmem>>, vector<1x512xf32>,
    return
  }
  func.func @transform_0(%arg0: i32) -> (i32, i32) {
    %c0_i32 = arith.constant 0 : i32
    %c0_i32_0 = arith.constant 0 : i32
    return %arg0, %c0_i32 : i32, i32
  }
  func.func @transform_1(%arg0: i32) -> (i32, i32) {
    %c0_i32 = arith.constant 0 : i32
    %c0_i32_0 = arith.constant 0 : i32
    return %arg0, %c0_i32 : i32, i32
  }
}

</mosaic_0001>

<bundles_post_ra>
// kernel: presence_aware.1
= control target key start
LH: loop header
LB: loop body
LE: loop exit
PB: predicated region body
PF: predicated region fallthrough
CT: control target
= control target key end

     0   :  { %v381_v13 = vmov 683565275   ;;  %v382_v15 = vmov 2475754826   ;;  %v383_v17 = vmov 2131351028   ;;  %s456_s0 = inlined_call_operand.vmem [shape: f32[1,512], index: 0, kind: input, shape index: {}]   ;;  %s457_s1 = inlined_call_operand.vmem [shape: f32[1,512], index: 1, kind: output, shape index: {}]  }
   0x1   :  { %v8_v0 = vld [vmem:[%s456_s0] sm:$0xf]  ;;  %v384_v19 = vmov 2102212464   ;;  %v385_v21 = vmov 920167782  }
   0x2   :  { %v401_v1 = vmul.f32 3.1415927, %v8_v0  ;;  %v386_v28 = vmov 1326507024  }
   0x4   :  { %v70_v2 = vand.u32 2139095040, %v401_v1  ;;  %v67_v4 = vand.u32 2147483647, %v401_v1  ;;  %vm69_vm7 = vcmp.lt.s32.totalorder %v401_v1, 0  ;;  %vm159_vm9 = vweird.f32 %v401_v1 }
   0x6   :  { %v71_v3 = vshrl.u32 %v70_v2, 23  ;;  %v74_v7 = vand.u32 8388607, %v67_v4  ;;  %vm68_vm8 = vcmp.le.f32.partialorder %v67_v4, 0.7853982 }
   0x8   :  { %v358_v5 = vadd.s32 4294967169, %v71_v3  ;;  %v75_v10 = vor.u32 8388608, %v74_v7 }
   0xa   :  { %v77_v6 = vadd.s32 1, %v358_v5  ;;  %v115_v30 = vshll.u32 %v75_v10, 8 }
   0xc   :  { %vm78_vm0 = vcmp.gt.s32.totalorder %v77_v6, 0 }
   0xd   :  { %v79_v8 = vsel %vm78_vm0, %v77_v6, 0 }
   0xe   :  { %v81_v9 = vand.u32 31, %v79_v8  ;;  %v80_v11 = vshrl.u32 %v79_v8, 5 }
  0x10   :  { %v82_v12 = vsub.s32 32, %v81_v9  ;;  %v84_v14 = vshll.u32 %v381_v13, %v81_v9  ;;  %v87_v16 = vshll.u32 %v382_v15, %v81_v9  ;;  %v90_v18 = vshll.u32 %v383_v17, %v81_v9 }
  0x11   :  { %v93_v20 = vshll.u32 %v384_v19, %v81_v9  ;;  %v96_v22 = vshll.u32 %v385_v21, %v81_v9  ;;  %vm99_vm1 = vcmp.lt.s32.totalorder %v80_v11, 1  ;;  %vm102_vm2 = vcmp.lt.s32.totalorder %v80_v11, 4 }
  0x12   :  { %v83_v23 = vshrl.u32 %v381_v13, %v82_v12  ;;  %v85_v24 = vshrl.u32 %v382_v15, %v82_v12  ;;  %v88_v25 = vshrl.u32 %v383_v17, %v82_v12  ;;  %v91_v26 = vshrl.u32 %v384_v19, %v82_v12 }
  0x13   :  { %v94_v27 = vshrl.u32 %v385_v21, %v82_v12  ;;  %v97_v29 = vshrl.u32 %v386_v28, %v82_v12  ;;  %vm100_vm3 = vcmp.lt.s32.totalorder %v80_v11, 2  ;;  %vm101_vm4 = vcmp.lt.s32.totalorder %v80_v11, 3 }
  0x14   :  { %v86_v31 = vor.u32 %v85_v24, %v84_v14  ;;  %v89_v32 = vor.u32 %v88_v25, %v87_v16  ;;  %v92_v33 = vor.u32 %v91_v26, %v90_v18  ;;  %v10_v18 = vlaneseq }
  0x15   :  { %v95_v34 = vor.u32 %v94_v27, %v93_v20  ;;  %v98_v35 = vor.u32 %v97_v29, %v96_v22 }
  0x16   :  { %v103_v36 = vsel %vm99_vm1, %v83_v23, %v86_v31  ;;  %v104_v37 = vsel %vm102_vm2, %v92_v33, 2102212464  ;;  %v107_v38 = vsel %vm99_vm1, %v86_v31, %v89_v32  ;;  %v111_v39 = vsel %vm99_vm1, %v89_v32, %v92_v33 }
  0x17   :  { %v105_v40 = vsel %vm101_vm4, %v89_v32, %v104_v37  ;;  %v108_v41 = vsel %vm102_vm2, %v95_v34, 920167782  ;;  %v112_v42 = vsel %vm102_vm2, %v98_v35, 1326507024  ;;  %v11_v22 = vand.u32 127, %v10_v18 }
  0x18   :  { %v109_v43 = vsel %vm101_vm4, %v92_v33, %v108_v41  ;;  %v113_v44 = vsel %vm101_vm4, %v95_v34, %v112_v42  ;;  %v106_v45 = vsel %vm100_vm3, %v103_v36, %v105_v40  ;;  %v276_v29 = vshrl.u32 %v10_v18, 7 }
  0x19   :  { %v110_v46 = vsel %vm100_vm3, %v107_v38, %v109_v43  ;;  %v114_v47 = vsel %vm100_vm3, %v111_v39, %v113_v44  ;;  %v122_v52 = vmul.u32 %v115_v30, %v106_v45  ;;  %v12_v24 = vadd.s32 128, %v11_v22 }
  0x1a   :  { %v407_v48 = vmul.u32.u64.low %v115_v30, %v114_v47  ;;  %v408_v49 = vmul.u32.u64.high %v115_v30, %v114_v47, %v407_v48  ;;  %v410_v50 = vmul.u32.u64.low %v115_v30, %v110_v46  ;;  %v411_v51 = vmul.u32.u64.high %v115_v30, %v110_v46, %v410_v50 }
  0x1b   :  { %v13_v25 = vadd.s32 256, %v11_v22  ;;  %v14_v26 = vadd.s32 384, %v11_v22  ;;  %v19_v4 = vand.u32 1, %v11_v22  ;;  %v26_v30 = vand.u32 1, %v12_v24 }
  0x1c   :  { %vm124_vm5 = vc.u32 %v408_v49, %v410_v50  ;;  %v125_v53 = vadd.s32 1, %v411_v51  ;;  %v123_v0 = vadd.s32 %v410_v50, %v408_v49  ;;  %v277_v34 = vsub.s32 0, %v276_v29 }
  0x1d   :  { %v33_v31 = vand.u32 1, %v13_v25  ;;  %v40_v33 = vand.u32 1, %v14_v26  ;;  %v387_v37 = vmov 1966171168   ;;  %v281_v40 = vsub.s32 1, %v276_v29 }
  0x1e   :  { %v126_v54 = vsel %vm124_vm5, %v125_v53, %v411_v51  ;;  %v327_v38 = vunpack.c.l.s4 %v387_v37  ;;  %v285_v43 = vsub.s32 2, %v276_v29  ;;  %v289_v44 = vsub.s32 3, %v276_v29 }
  0x1f   :  { %v127_v55 = vadd.s32 %v126_v54, %v122_v52  ;;  %vm424_vm0 = vcmp.eq.s32.totalorder %v19_v4, 0  ;;  %vm428_vm1 = vcmp.eq.s32.totalorder %v26_v30, 0  ;;  %vm432_vm2 = vcmp.eq.s32.totalorder %v33_v31, 0 }
  0x20   :  { %v328_v51 = vunpack.c.0.s8 %v327_v38  ;;  %vm436_vm3 = vcmp.eq.s32.totalorder %v40_v33, 0  ;;  %vm351_vm4 = vcmp.lt.s32.totalorder %v10_v18, 512 }
  0x21   :  { %v128_v56 = vadd.s32 536870912, %v127_v55 }
  0x23   :  { %v129_v57 = vshrl.u32 %v128_v56, 30 }
  0x25   :  { %v130_v58 = vshll.u32 %v129_v57, 30  ;;  %v153_v14 = vsub.s32 4, %v129_v57 }
  0x27   :  { %v131_v59 = vsub.s32 %v127_v55, %v130_v58  ;;  %v154_v17 = vsel %vm69_vm7, %v153_v14, %v129_v57 }
  0x28   :  { %v156_v21 = vsel %vm68_vm8, 0, %v154_v17 }
  0x29   :  { %v133_v60 = vsub.s32 0, %v131_v59  ;;  %v160_v23 = vadd.s32 3, %v156_v21  ;;  %v264_v28 = vand.u32 3, %v156_v21 }
  0x2b   :  { %v359_v61 = vmin.u32 %v133_v60, %v131_v59  ;;  %v161_v27 = vand.u32 3, %v160_v23  ;;  %vm269_vm11 = vcmp.eq.s32.totalorder %v264_v28, 2  ;;  %vm266_vm13 = vcmp.eq.s32.totalorder %v264_v28, 0 }
  0x2c   :  { %vm265_vm15 = vcmp.lt.s32.totalorder %v264_v28, 2 }
  0x2d   :  { %v135_v62 = vclz %v359_v61  ;;  %vm166_vm10 = vcmp.eq.s32.totalorder %v161_v27, 2  ;;  %vm163_vm12 = vcmp.eq.s32.totalorder %v161_v27, 0  ;;  %vm162_vm14 = vcmp.lt.s32.totalorder %v161_v27, 2 }
  0x2f   :  { %v360_v63 = vadd.s32 4294967294, %v135_v62 }
  0x31   :  { %vm361_vm6 = vcmp.lt.s32.totalorder %v360_v63, 0 }
  0x32   :  { %v138_v2 = vsel %vm361_vm6, 0, %v360_v63 }
  0x33   :  { %v139_v3 = vsub.s32 32, %v138_v2  ;;  %v140_v5 = vshll.u32 %v131_v59, %v138_v2  ;;  %v143_v6 = vsub.s32 4294967266, %v138_v2 }
  0x35   :  { %v141_v7 = vshrl.u32 %v123_v0, %v139_v3  ;;  %v144_v8 = vadd.s32 127, %v143_v6  ;;  %v331_v0 = vsub.s32 %v328_v51, %v276_v29 }
  0x37   :  { %v142_v9 = vor.u32 %v141_v7, %v140_v5  ;;  %v145_v10 = vshll.u32 %v144_v8, 23 }
  0x39   :  { %v146_v11 = vor.u32 4788187, %v145_v10  ;;  %v149_v12 = vcvt.s32.f32 %v142_v9 }
  0x3b   :  { %v147_v13 = vand.u32 2147483647, %v146_v11 }
  0x3d   :  { %v150_v15 = vmul.f32 %v149_v12, %v147_v13 }
  0x3f   :  { %v151_v16 = vxor.u32 2147483648, %v150_v15 }
  0x41   :  { %v152_v19 = vsel %vm69_vm7, %v151_v16, %v150_v15 }
  0x42   :  { %v155_v20 = vsel %vm68_vm8, %v401_v1, %v152_v19 }
  0x43   :  { %377 = vcosq.f32 %v155_v20 }
  0x44   :  { %379 = vsinq.f32 %v155_v20 }
  0x4d   :  { %v378_v32 = vpop.eup %377 }
  0x4e   :  { %v380_v35 = vpop.eup %379  ;;  %v167_v36 = vxor.u32 2147483648, %v378_v32 }
  0x4f   :  { %v164_v39 = vxor.u32 2147483648, %v380_v35 }
  0x50   :  { %v168_v41 = vsel %vm166_vm10, %v167_v36, %v380_v35  ;;  %v271_v42 = vsel %vm269_vm11, %v167_v36, %v380_v35 }
  0x51   :  { %v165_v46 = vsel %vm163_vm12, %v378_v32, %v164_v39  ;;  %v268_v47 = vsel %vm266_vm13, %v378_v32, %v164_v39 }
  0x52   :  { %v169_v49 = vsel %vm162_vm14, %v165_v46, %v168_v41  ;;  %v272_v50 = vsel %vm265_vm15, %v268_v47, %v271_v42 }
  0x53   :  { %v170_v54 = vsel %vm159_vm9, nan, %v169_v49  ;;  %v273_v55 = vsel %vm159_vm9, nan, %v272_v50 }
  0x54   :  { %v278_v56 = vrot.slane %v170_v54, %v277_v34  ;;  %v282_v57 = vrot.slane %v170_v54, %v281_v40  ;;  %v286_v58 = vrot.slane %v170_v54, %v285_v43  ;;  %v290_v59 = vrot.slane %v170_v54, %v289_v44 }
  0x55   :  { %v299_v60 = vrot.slane %v273_v55, %v277_v34  ;;  %v303_v61 = vrot.slane %v273_v55, %v281_v40  ;;  %v307_v62 = vrot.slane %v273_v55, %v285_v43  ;;  %v311_v63 = vrot.slane %v273_v55, %v289_v44 }
  0x57   :  { %v316_v2 = vsel %vm424_vm0, %v278_v56, %v299_v60  ;;  %v317_v3 = vsel %vm428_vm1, %v282_v57, %v303_v61  ;;  %v318_v5 = vsel %vm432_vm2, %v286_v58, %v307_v62  ;;  %v319_v1 = vsel %vm436_vm3, %v290_v59, %v311_v63 }
  0x58   :  { %v324_v6 = vcombine.low %v316_v2, %v317_v3  ;;  %v325_v7 = vcombine.low %v318_v5, %v319_v1 }
  0x5a   :  { %v332_v8 = vrot.slane %v324_v6, %v331_v0  ;;  %v339_v9 = vrot.slane %v325_v7, %v331_v0 }
  0x5c   :  { %v340_v10 = vcombine.low %v332_v8, %v339_v9 }
  0x5e   :  { %v347_v11 = vrot.slane %v340_v10, %v331_v0 }
  0x60   :  { %353 = vst.msk [vmem:[%s457_s1] sm:$0xf] %vm351_vm4, %v347_v11 }

</bundles_post_ra>
